<compile_context>
chip_gen: v6e
topology: v6e:2x2x1
jax: 0.10.0
libtpu: 0.0.40
codegen_flags: <defaults>
</compile_context>

<pallas_src>
import math

import jax
import jax.numpy as jnp
import numpy as np
from jax.experimental import pallas as pl
from jax.experimental.pallas import tpu as pltpu


# ---------------------------- Pallas kernel ----------------------------

def _ffn_kernel(x_ref, w1_ref, b1_ref, w2_ref, b2_ref, o_ref, acc_ref):
    """One (row-tile, d_ff-tile) step of the fused position-wise FFN.

    Grid = (M_tiles, F_tiles).  The F axis is a reduction axis for the second
    matmul: partial products are accumulated in an f32 VMEM scratch and the
    output tile is written (+ b2) on the last F step only.
    """
    f = pl.program_id(1)

    @pl.when(f == 0)
    def _init():
        acc_ref[...] = jnp.zeros_like(acc_ref)

    # First matmul on the MXU with f32 accumulation; bias + ReLU in f32 (VPU).
    h = jnp.dot(x_ref[...], w1_ref[...], preferred_element_type=jnp.float32)
    h = jnp.maximum(h + b1_ref[...], 0.0)

    # Second matmul: cast the activation tile back to the (bf16) weight dtype
    # for the MXU, accumulate into the f32 scratch.
    acc_ref[...] += jnp.dot(h.astype(w2_ref.dtype), w2_ref[...],
                            preferred_element_type=jnp.float32)

    @pl.when(f == pl.num_programs(1) - 1)
    def _finalize():
        o_ref[...] = (acc_ref[...] + b2_ref[...]).astype(o_ref.dtype)


# ---------------------------- wrapper ----------------------------

def positionwise_feed_forward(x, w1, b1, w2, b2, *, block_m=256, block_f=None,
                              use_bf16_matmul=True, interpret=False):
    """y = relu(x @ w1 + b1) @ w2 + b2  (dropout is identity at inference).

    x:  [..., d_model] float32
    w1: [d_model, d_ff]   (torch Linear weight transposed)
    b1: [d_ff]
    w2: [d_ff, d_model]
    b2: [d_model]
    """
    # TODO(synk): dropout is not applied (inference / eval semantics).
    orig_shape = x.shape
    d_model = orig_shape[-1]
    m = int(np.prod(orig_shape[:-1]))
    d_ff = w1.shape[1]

    # Row tile: multiple of 8 sublanes, capped at block_m.
    tm = max(8, min(block_m, ((m + 7) // 8) * 8))

    # d_ff tile: keep whole unless d_ff is large, then tile by a multiple of 128.
    if block_f is None:
        block_f = d_ff
        if d_ff > 2048:
            for cand in (2048, 1024, 512):
                if d_ff % cand == 0:
                    block_f = cand
                    break
    assert d_ff % block_f == 0, "block_f must divide d_ff"
    tf = block_f

    mm_dtype = jnp.bfloat16 if use_bf16_matmul else jnp.float32
    x2d = x.reshape(m, d_model).astype(mm_dtype)
    w1c = w1.astype(mm_dtype)
    w2c = w2.astype(mm_dtype)
    b1r = b1.reshape(1, d_ff).astype(jnp.float32)
    b2r = b2.reshape(1, d_model).astype(jnp.float32)

    grid = (pl.cdiv(m, tm), d_ff // tf)

    # Rough VMEM budget (double-buffered inputs/outputs + scratch + h tile).
    isz = jnp.dtype(mm_dtype).itemsize
    vmem_est = (2 * tm * d_model * isz        # x tiles
                + 2 * d_model * tf * isz      # w1 tile
                + 2 * tf * d_model * isz      # w2 tile
                + 2 * (tf + d_model) * 4      # biases
                + 2 * tm * d_model * 4        # out tiles
                + tm * d_model * 4            # f32 accumulator scratch
                + tm * tf * 4)                # h intermediate
    vmem_limit = int(min(max(2 * vmem_est, 32 * 1024 * 1024), 64 * 1024 * 1024))

    # CostEstimate fields must be ints.
    flops = int(4 * m * d_model * d_ff)       # two matmuls
    bytes_accessed = int(x2d.size * isz + w1c.size * isz + w2c.size * isz
                         + b1r.size * 4 + b2r.size * 4 + m * d_model * 4)

    out = pl.pallas_call(
        _ffn_kernel,
        out_shape=jax.ShapeDtypeStruct((m, d_model), jnp.float32),
        grid_spec=pltpu.PrefetchScalarGridSpec(
            num_scalar_prefetch=0,
            grid=grid,
            in_specs=[
                pl.BlockSpec((tm, d_model), lambda i, f: (i, 0)),   # x (resident over F)
                pl.BlockSpec((d_model, tf), lambda i, f: (0, f)),   # w1 (resident over M)
                pl.BlockSpec((1, tf),       lambda i, f: (0, f)),   # b1
                pl.BlockSpec((tf, d_model), lambda i, f: (f, 0)),   # w2 (resident over M)
                pl.BlockSpec((1, d_model),  lambda i, f: (0, 0)),   # b2
            ],
            out_specs=pl.BlockSpec((tm, d_model), lambda i, f: (i, 0)),
            scratch_shapes=[pltpu.VMEM((tm, d_model), jnp.float32)],
        ),
        compiler_params=pltpu.CompilerParams(
            dimension_semantics=("parallel", "arbitrary"),
            vmem_limit_bytes=vmem_limit,
        ),
        cost_estimate=pl.CostEstimate(flops=flops, transcendentals=0,
                                      bytes_accessed=bytes_accessed),
        interpret=interpret,
    )(x2d, w1c, b1r, w2c, b2r)

    return out.reshape(orig_shape[:-1] + (d_model,))


# ---------------------------- main ----------------------------

if __name__ == "__main__":
    B, S = 2, 8
    d_model, d_ff = 32, 64

    key = jax.random.PRNGKey(0)
    kx, kw1, kb1, kw2, kb2 = jax.random.split(key, 5)

    x = jax.random.normal(kx, (B, S, d_model), jnp.float32)
    # torch nn.Linear stores weight as [out, in]; we store the transpose [in, out].
    w1 = jax.random.normal(kw1, (d_model, d_ff), jnp.float32) / math.sqrt(d_model)
    b1 = jax.random.normal(kb1, (d_ff,), jnp.float32) * 0.1
    w2 = jax.random.normal(kw2, (d_ff, d_model), jnp.float32) / math.sqrt(d_ff)
    b2 = jax.random.normal(kb2, (d_model,), jnp.float32) * 0.1

    out = positionwise_feed_forward(x, w1, b1, w2, b2)
    out = jax.block_until_ready(out)

    # Pure-JAX f32 reference (dropout is identity at inference).
    ref = jnp.maximum(x @ w1 + b1, 0.0) @ w2 + b2

    assert out.shape == (B, S, d_model), out.shape
    assert bool(jnp.all(jnp.isfinite(out)))
    np.testing.assert_allclose(np.asarray(out), np.asarray(ref),
                               rtol=5e-2, atol=5e-2)
    print("KERNEL_OK")
</pallas_src>

<mosaic_0001>
module attributes {stable_mosaic.version = 11 : i64} {
  func.func @_ffn_kernel(%arg0: i32, %arg1: i32, %arg2: memref<16x32xbf16, #tpu.memory_space<vmem>>, %arg3: memref<32x64xbf16, #tpu.memory_space<vmem>>, %arg4: memref<1x64xf32, #tpu.memory_space<vmem>>, %arg5: memref<64x32xbf16, #tpu.memory_space<vmem>>, %arg6: memref<1x32xf32, #tpu.memory_space<vmem>>, %arg7: memref<16x32xf32, #tpu.memory_space<vmem>>, %arg8: memref<16x32xf32, #tpu.memory_space<vmem>>) attributes {dimension_semantics = [#tpu.dimension_semantics<parallel>, #tpu.dimension_semantics<arbitrary>], iteration_bounds = array<i64: 1, 1>, scalar_prefetch = 0 : i64, scratch_operands = 1 : i64, tpu.core_type = #tpu.core_type<tc>, window_params = [{transform_indices = @transform_0, window_bounds = array<i64: 16, 32>}, {transform_indices = @transform_1, window_bounds = array<i64: 32, 64>}, {transform_indices = @transform_2, window_bounds = array<i64: 1, 64>}, {transform_indices = @transform_3, window_bounds = array<i64: 64, 32>}, {pipeline_mode = #tpu.pipeline_mode<synchronous>, transform_indices = @transform_4, window_bounds = array<i64: 1, 32>}, {transform_indices = @transform_5, window_bounds = array<i64: 16, 32>}]} {
    %c0_i32 = arith.constant 0 : i32
    %0 = arith.cmpi eq, %arg1, %c0_i32 : i32
    %1 = arith.extui %0 : i1 to i32
    %c0_i32_0 = arith.constant 0 : i32
    %2 = arith.cmpi ne, %1, %c0_i32_0 : i32
    scf.if %2 {
      %cst_16 = arith.constant 0.000000e+00 : f32
      %20 = vector.broadcast %cst_16 : f32 to vector<16x32xf32>
      %c0_17 = arith.constant 0 : index
      %c0_18 = arith.constant 0 : index
      %21 = vector.load %arg8[%c0_17, %c0_18] : memref<16x32xf32, #tpu.memory_space<vmem>>, vector<16x32xf32>
      tpu.vector_store %arg8[%c0_17, %c0_18], %20 {strides = array<i32>} : memref<16x32xf32, #tpu.memory_space<vmem>>, vector<16x32xf32>,
    } else {
    }
    %c0 = arith.constant 0 : index
    %c0_1 = arith.constant 0 : index
    %3 = vector.load %arg2[%c0, %c0_1] : memref<16x32xbf16, #tpu.memory_space<vmem>>, vector<16x32xbf16>
    %c0_2 = arith.constant 0 : index
    %c0_3 = arith.constant 0 : index
    %4 = vector.load %arg3[%c0_2, %c0_3] : memref<32x64xbf16, #tpu.memory_space<vmem>>, vector<32x64xbf16>
    %cst = arith.constant dense<0.000000e+00> : vector<16x64xf32>
    %5 = tpu.matmul %3, %4, %cst {dimension_numbers = #tpu.dot_dimension_numbers<[1], [0], [0], [1], [0, 0, 1, 1], [], []>} : vector<16x32xbf16>, vector<32x64xbf16>, vector<16x64xf32> -> vector<16x64xf32>
    %c0_4 = arith.constant 0 : index
    %c0_5 = arith.constant 0 : index
    %6 = vector.load %arg4[%c0_4, %c0_5] : memref<1x64xf32, #tpu.memory_space<vmem>>, vector<1x64xf32>
    %7 = vector.broadcast %6 : vector<1x64xf32> to vector<16x64xf32>
    %8 = arith.addf %5, %7 : vector<16x64xf32>
    %cst_6 = arith.constant 0.000000e+00 : f32
    %9 = vector.broadcast %cst_6 : f32 to vector<16x64xf32>
    %10 = arith.maximumf %8, %9 : vector<16x64xf32>
    %c0_7 = arith.constant 0 : index
    %c0_8 = arith.constant 0 : index
    %11 = vector.load %arg8[%c0_7, %c0_8] : memref<16x32xf32, #tpu.memory_space<vmem>>, vector<16x32xf32>
    %12 = arith.truncf %10 : vector<16x64xf32> to vector<16x64xbf16>
    %c0_9 = arith.constant 0 : index
    %c0_10 = arith.constant 0 : index
    %13 = vector.load %arg5[%c0_9, %c0_10] : memref<64x32xbf16, #tpu.memory_space<vmem>>, vector<64x32xbf16>
    %cst_11 = arith.constant dense<0.000000e+00> : vector<16x32xf32>
    %14 = tpu.matmul %12, %13, %cst_11 {dimension_numbers = #tpu.dot_dimension_numbers<[1], [0], [0], [1], [0, 0, 1, 1], [], []>} : vector<16x64xbf16>, vector<64x32xbf16>, vector<16x32xf32> -> vector<16x32xf32>
    %15 = arith.addf %11, %14 : vector<16x32xf32>
    %c0_12 = arith.constant 0 : index
    %c0_13 = arith.constant 0 : index
    %16 = vector.load %arg8[%c0_12, %c0_13] : memref<16x32xf32, #tpu.memory_space<vmem>>, vector<16x32xf32>
    tpu.vector_store %arg8[%c0_12, %c0_13], %15 {strides = array<i32>} : memref<16x32xf32, #tpu.memory_space<vmem>>, vector<16x32xf32>,
    %c0_i32_14 = arith.constant 0 : i32
    %17 = arith.cmpi eq, %arg1, %c0_i32_14 : i32
    %18 = arith.extui %17 : i1 to i32
    %c0_i32_15 = arith.constant 0 : i32
    %19 = arith.cmpi ne, %18, %c0_i32_15 : i32
    scf.if %19 {
      %c0_16 = arith.constant 0 : index
      %c0_17 = arith.constant 0 : index
      %20 = vector.load %arg8[%c0_16, %c0_17] : memref<16x32xf32, #tpu.memory_space<vmem>>, vector<16x32xf32>
      %c0_18 = arith.constant 0 : index
      %c0_19 = arith.constant 0 : index
      %21 = vector.load %arg6[%c0_18, %c0_19] : memref<1x32xf32, #tpu.memory_space<vmem>>, vector<1x32xf32>
      %22 = vector.broadcast %21 : vector<1x32xf32> to vector<16x32xf32>
      %23 = arith.addf %20, %22 : vector<16x32xf32>
      %c0_20 = arith.constant 0 : index
      %c0_21 = arith.constant 0 : index
      %24 = vector.load %arg7[%c0_20, %c0_21] : memref<16x32xf32, #tpu.memory_space<vmem>>, vector<16x32xf32>
      tpu.vector_store %arg7[%c0_20, %c0_21], %23 {strides = array<i32>} : memref<16x32xf32, #tpu.memory_space<vmem>>, vector<16x32xf32>,
    } else {
    }
    return
  }
  func.func @transform_0(%arg0: i32, %arg1: i32) -> (i32, i32) {
    %c0_i32 = arith.constant 0 : i32
    %c0_i32_0 = arith.constant 0 : i32
    return %arg0, %c0_i32 : i32, i32
  }
  func.func @transform_1(%arg0: i32, %arg1: i32) -> (i32, i32) {
    %c0_i32 = arith.constant 0 : i32
    %c0_i32_0 = arith.constant 0 : i32
    return %c0_i32, %arg1 : i32, i32
  }
  func.func @transform_2(%arg0: i32, %arg1: i32) -> (i32, i32) {
    %c0_i32 = arith.constant 0 : i32
    %c0_i32_0 = arith.constant 0 : i32
    return %c0_i32, %arg1 : i32, i32
  }
  func.func @transform_3(%arg0: i32, %arg1: i32) -> (i32, i32) {
    %c0_i32 = arith.constant 0 : i32
    %c0_i32_0 = arith.constant 0 : i32
    return %arg1, %c0_i32 : i32, i32
  }
  func.func @transform_4(%arg0: i32, %arg1: i32) -> (i32, i32) {
    %c0_i32 = arith.constant 0 : i32
    %c0_i32_0 = arith.constant 0 : i32
    %c0_i32_1 = arith.constant 0 : i32
    return %c0_i32, %c0_i32_0 : i32, i32
  }
  func.func @transform_5(%arg0: i32, %arg1: i32) -> (i32, i32) {
    %c0_i32 = arith.constant 0 : i32
    %c0_i32_0 = arith.constant 0 : i32
    return %arg0, %c0_i32 : i32, i32
  }
}

</mosaic_0001>

<bundles_post_ra>
// kernel: tpu_custom_call.1
= control target key start
LH: loop header
LB: loop body
LE: loop exit
PB: predicated region body
PF: predicated region fallthrough
CT: control target
= control target key end

     0   :  { %v295_v1 = vmov 0.0   ;;  %vm296_vm0 = vmmov 0   ;;  %vm26_vm1 = vcmask 261120   ;;  %s367_s0 = inlined_call_operand.vmem [shape: bf16[16,32], index: 0, kind: input, shape index: {}]   ;;  %s368_s1 = inlined_call_operand.vmem [shape: bf16[32,64], index: 1, kind: input, shape index: {}]   ;;  %s369_s2 = inlined_call_operand.vmem [shape: f32[1,64], index: 2, kind: input, shape index: {}]   ;;  %s370_s3 = inlined_call_operand.vmem [shape: bf16[64,32], index: 3, kind: input, shape index: {}]   ;;  %s371_s4 = inlined_call_operand.vmem [shape: f32[1,32], index: 4, kind: input, shape index: {}]   ;;  %s372_s5 = inlined_call_operand.hbm [shape: f32[16,32], index: 5, kind: output, shape index: {}]  }
   0x1   :  { %v266_v0 = vld [vmem:[%s368_s1 + $0x8] sm:$0xff]   ;;  %241 = vmatprep.subr.bf16.mxu0 %v295_v1  ;;  %249 = vmatprep.subr.bf16.mxu1 %v295_v1  ;;  %v267_v2 = vld [vmem:[%s368_s1] sm:$0xff]   ;;  %27 = vst.msk [vmem:[#allocation2] sm:$0xff] %vm26_vm1, %v295_v1  ;;  %28 = vst.msk [vmem:[#allocation2 + $0x8] sm:$0xff] %vm26_vm1, %v295_v1 }
   0x2   :  { %242 = vmatpush3.bf16.msra.mxu0 %v266_v0  ;;  %245 = vmatprep.mubr.msk.bf16.mxu0 %vm296_vm0, %v295_v1  ;;  %v269_v3 = vld [vmem:[%s370_s3 + $0x18] sm:$0xff]   ;;  %v268_v4 = vld [vmem:[%s367_s0] sm:$0xff]  }
   0x3   :  { %243 = vmatprep.subr.bf16.mxu0 %v295_v1  ;;  %257 = vmatprep.mubr.msk.bf16.mxu1 %vm296_vm0, %v295_v1 }
   0x4   :  { %250 = vmatpush3.bf16.msra.mxu1 %v269_v3 }
   0x5   :  { %251 = vmatprep.subr.bf16.mxu1 %v295_v1 }
   0x6   :  { %244 = vmatpush3.bf16.msra.mxu0 %v267_v2 }
   0x7   :  { %10 = vsyncpa [#allocation4], 0  ;;  %v270_v5 = vld [vmem:[%s370_s3 + $0x10] sm:$0xff]   ;;  %v271_v6 = vld [vmem:[%s370_s3 + $0x8] sm:$0xff]   ;;  %vm141_vm2 = vcmask 523264   ;;  %s297_s7 = smov [#allocation3]  }
   0x8   :  { %252 = vmatpush3.bf16.msra.mxu1 %v270_v5  ;;  %v272_v7 = vld [vmem:[%s370_s3] sm:$0xff]   ;;  %v107_v22 = vld [vmem:[#allocation2 + $0x8] sm:$0xff]  ;;  %s211_s8 = sshll.u32 %s297_s7, 4  ;;  %s212_s8 = int_to_ptr.vmem [resolvable:$true] %s211_s8 }
   0x9   :  { %246 = vmatmul.mubr.msk.bf16.vlgmr.msra.gmra.mxu0 %vm26_vm1, %v268_v4  ;;  %253 = vmatprep.subr.bf16.mxu1 %v295_v1  ;;  %v222_v8 = vld [vmem:[%s369_s2] ss:$0 sm:$0xff]  ;;  %s273_s9 = scalar_lea.vmem %s212_s8, 256  ;;  %p278_p1 = scmp.lt.s32.totalorder %s212_s8, %s212_s8 }
   0xa   :  { %v106_v18 = vld [vmem:[#allocation2] sm:$0xff]  ;;  %p274_p0 = scmp.ne.s32.totalorder %s212_s8, %s273_s9  ;;  %p279_p2 = scmp.lt.s32.totalorder %s273_s9, %s273_s9 }
   0xb   :  { %v232_v26 = vld [vmem:[%s371_s4] ss:$0 sm:$0xff] }
   0xc   :  { %254 = vmatpush3.bf16.msra.mxu1 %v271_v6  ;;  %p280_p3 = por %p279_p2, %p278_p1 }
   0xd   :  { %255 = vmatprep.subr.bf16.mxu1 %v295_v1 }
   0xe   :  { %p281_p4 = pnand %p280_p3, %p274_p0 }
  0x10   :  { %256 = vmatpush3.bf16.msra.mxu1 %v272_v7 }
  0xc9   :  { %v97_v9 = vpop.f32.mrf.mxu0 }
  0xca   :  { %v98_v11 = vadd.f32 %v222_v8, %v97_v9 }
  0xcb   :  { %v247_v10 = vpop.f32.mrf.mxu0 }
  0xcc   :  { %v104_v15 = vmax.f32 %v98_v11, 0.0 }
  0xcd   :  { %v100_v12 = vpop.f32.mrf.mxu0 }
  0xce   :  { %v101_v13 = vadd.f32 %v222_v8, %v100_v12 }
  0xcf   :  { %v248_v14 = vpop.f32.mrf.mxu0 }
  0xd0   :  { %v105_v16 = vmax.f32 %v101_v13, 0.0 }
  0xd2   :  { %v108_v17 = vpack.c.bf16 %v105_v16, %v104_v15 }
  0xd4   :  { %258 = vmatmul.mubr.msk.bf16.vlgmr.msra.gmra.mxu1 %vm141_vm2, %v108_v17 }
 0x194   :  { %v179_v19 = vpop.f32.mrf.mxu1 }
 0x195   :  { %v186_v20 = vadd.f32 %v179_v19, %v106_v18 }
 0x196   :  { %v259_v21 = vpop.f32.mrf.mxu1 }
 0x197   :  { %188 = vst.msk [vmem:[#allocation2] sm:$0xff] %vm26_vm1, %v186_v20 }
 0x198   :  { %v182_v23 = vpop.f32.mrf.mxu1 }
 0x199   :  { %v187_v24 = vadd.f32 %v182_v23, %v107_v22 }
 0x19a   :  { %v260_v25 = vpop.f32.mrf.mxu1 }
 0x19b   :  { %189 = vst.msk [vmem:[#allocation2 + $0x8] sm:$0xff] %vm26_vm1, %v187_v24 }
 0x19e   :  { %v193_v27 = vld [vmem:[#allocation2] sm:$0xff] }
 0x19f   :  { %v202_v28 = vadd.f32 %v232_v26, %v193_v27 }
 0x1a1   :  { %204 = vst.msk [vmem:[#allocation3] sm:$0xff] %vm26_vm1, %v202_v28 }
 0x1a2   :  { %v194_v29 = vld [vmem:[#allocation2 + $0x8] sm:$0xff] }
 0x1a3   :  { %v203_v30 = vadd.f32 %v232_v26, %v194_v29 }
 0x1a5   :  { %205 = vst.msk [vmem:[#allocation3 + $0x8] sm:$0xff] %vm26_vm1, %v203_v30 }
 0x1a6   :  { %284 = shalt.err (!%p281_p4)
}
 0x1a7   :  { %s298_s10 = smov 128   ;;  %s299_s4 = smov 8  }
 0x1a8   :  { %217 = dma.vmem_to_hbm [thread:$0]  %s212_s8, 256, %s372_s5, [#allocation4], %s298_s10, %s298_s10, %s299_s4  }
 0x1a9   :  { %293 = dma.done.wait [#allocation4], 256  }
 0x1aa   :  { %294 = vsyncadd [#allocation4], 4294967040 }
 0x1ab   :  { %221 = vsyncpa [#allocation4], 1 }

</bundles_post_ra>
